<compile_context>
chip_gen: v6e
topology: v6e:2x2x1
jax: 0.10.0
libtpu: 0.0.40
codegen_flags: <defaults>
</compile_context>

<pallas_src>
import functools
from math import cos, pi, sqrt

import jax
import jax.numpy as jnp
from jax.experimental import pallas as pl
from jax.experimental.pallas import tpu as pltpu


# ---------------------------------------------------------------------------
# DCT filter construction (mirrors DCTLayer.get_dct_filter / build_filter)
# ---------------------------------------------------------------------------
def build_filter(pos, freq, POS):
    result = cos(pi * freq * (pos + 0.5) / POS) / sqrt(POS)
    return result if freq == 0 else result * sqrt(2)


def get_dct_filter(length_feature, mapper_x, channel):
    assert channel % len(mapper_x) == 0
    c_part = channel // len(mapper_x)
    filt = [[0.0] * length_feature for _ in range(channel)]
    for i, u_x in enumerate(mapper_x):
        for t_x in range(length_feature):
            v = build_filter(t_x, u_x, length_feature)
            for c in range(i * c_part, (i + 1) * c_part):
                filt[c][t_x] = v
    return jnp.asarray(filt, dtype=jnp.float32)  # (channel, length)


# ---------------------------------------------------------------------------
# Pallas kernel: one MXU matmul per (channel-tile, batch-tile) grid cell.
#   x_ref: (TB, TC*L)      input tile (f32 or bf16)
#   w_ref: (TC*L, TC_pad)  folded block-diagonal weight block (same dtype)
#   o_ref: (TB, TC_pad)    f32 output tile (128-lane-dense stores)
# ---------------------------------------------------------------------------
def _dct_kernel(x_ref, w_ref, o_ref, *, precision):
    o_ref[...] = jnp.dot(
        x_ref[...], w_ref[...],
        preferred_element_type=jnp.float32,
        precision=precision,
    )


# ---------------------------------------------------------------------------
# Sizing helpers
# ---------------------------------------------------------------------------
def _round_up(v, m):
    return (v + m - 1) // m * m


def _vmem_budget():
    """Returns (compiler vmem_limit_bytes, working-set budget for tile sizing)."""
    cap = None
    try:
        cap = getattr(pltpu.get_tpu_info(), "vmem_capacity_bytes", None)
    except Exception:  # query unsupported -> assume the smallest generation
        cap = None
    if not cap:
        cap = 64 * 1024 * 1024                      # v7x worst case (per TC)
    if cap >= 128 * 1024 * 1024:                    # v5e / v6e
        return 100 * 1024 * 1024, 80 * 1024 * 1024
    return 48 * 1024 * 1024, 36 * 1024 * 1024       # v7x


def _pick_channel_tiling(C, L, itemsize, budget):
    """Pick (channels-per-tile TC, padded out width, #tiles); None if no fit."""
    C_pad = _round_up(C, 128)
    dense_bytes = C * L * C_pad * itemsize
    if C <= 128 and 2 * dense_bytes <= budget // 3:
        return C, C_pad, 1                          # dense == diagonal block
    # Block-diagonal: largest TC <= 128 dividing C with lane-aligned TC*L,
    # whose double-buffered block leaves >= 2/3 of the budget for x/out tiles.
    for tc in range(min(C, 128), 0, -1):
        if C % tc == 0 and (tc * L) % 128 == 0:
            if 2 * tc * L * 128 * itemsize <= budget // 3:
                return tc, 128, C // tc
    if 2 * dense_bytes <= budget // 3:              # e.g. L not lane-tileable
        return C, C_pad, 1
    return None                                     # caller falls back to XLA


def _pack_weight_blocks(weight, tc, tc_pad, dtype):
    """W_seg[j, c*L + l, c] = weight[j*tc + c, l]; zero elsewhere."""
    C, L = weight.shape
    n = C // tc
    w = weight.reshape(n, tc, L).astype(jnp.float32)      # (n, tc, L)
    eye = jnp.eye(tc, tc_pad, dtype=jnp.float32)          # (tc, tc_pad)
    blocks = w[:, :, :, None] * eye[:, None, :]           # (n, tc, L, tc_pad)
    return blocks.reshape(n, tc * L, tc_pad).astype(dtype)


def _pick_batch_tile(B, per_row_bytes, avail_bytes, sub, max_tile_rows):
    cap = int(avail_bytes // max(per_row_bytes, 1)) // sub * sub
    cap = max(sub, min(cap, 2048))
    if max_tile_rows is not None:
        cap = max(sub, min(cap, (max_tile_rows // sub) * sub))
    if B > cap:
        return cap
    if B >= 2 * sub:
        # >= 2 grid steps: pipeline overlap everywhere, dual-TC sharding on v7x
        return min(cap, _round_up((B + 1) // 2, sub))
    return B


# ---------------------------------------------------------------------------
# Layer wrapper (mirrors the PyTorch module; builds folded weights ONCE)
# ---------------------------------------------------------------------------
class PallasDCTLayer:
    """Pallas-TPU equivalent of the PyTorch DCTLayer (forward pass)."""

    _SMALL_INPUT_BYTES = 2 * 1024 * 1024   # below this, fused XLA wins

    def __init__(self, length, mapper_x, channel):
        assert channel % len(mapper_x) == 0
        self.num_freq = len(mapper_x)
        self.length = int(length)
        self.channel = int(channel)
        self.weight = get_dct_filter(length, mapper_x, channel)   # (C, L) f32
        self._vmem_limit, self._budget = _vmem_budget()
        self._plans = {}   # compute-dtype name -> (tc, tc_pad, n_ctile, W_seg) | None

    # -- folded weight blocks, built once per compute dtype and cached -------
    def _plan(self, dtype):
        key = jnp.dtype(dtype).name
        if key not in self._plans:
            tiling = _pick_channel_tiling(
                self.channel, self.length, jnp.dtype(dtype).itemsize, self._budget)
            if tiling is None:
                self._plans[key] = None
            else:
                tc, tc_pad, n_ctile = tiling
                w_seg = _pack_weight_blocks(self.weight, tc, tc_pad, dtype)
                self._plans[key] = (tc, tc_pad, n_ctile, w_seg)
        return self._plans[key]

    def _xla_forward(self, x):
        return jnp.einsum("bcl,cl->bc", x.astype(jnp.float32), self.weight)

    def __call__(self, x, *, force_kernel=False, max_tile_rows=None):
        B, C, L = x.shape
        assert (C, L) == (self.channel, self.length)

        # bf16 feeds the MXU natively (f32 accumulation); anything else runs
        # as f32 with HIGHEST precision (no silent bf16 truncation).
        if x.dtype == jnp.bfloat16:
            cdtype, precision = jnp.bfloat16, jax.lax.Precision.DEFAULT
        else:
            cdtype, precision = jnp.float32, jax.lax.Precision.HIGHEST
            x = x.astype(jnp.float32)
        itemsize = jnp.dtype(cdtype).itemsize

        if not force_kernel and x.size * itemsize < self._SMALL_INPUT_BYTES:
            return self._xla_forward(x)             # per-call overhead dominates

        plan = self._plan(cdtype)
        if plan is None:
            # TODO(synk): add a length-axis reduction grid for configs whose
            # per-tile weight block cannot fit VMEM; fall back to fused XLA.
            return self._xla_forward(x)
        tc, tc_pad, n_ctile, w_seg = plan
        K = tc * L

        # VMEM working set: double-buffered x/out tiles + double-buffered
        # weight block (resident across the inner batch loop when invariant).
        sub = max(8, 32 // itemsize)                 # sublane multiple per dtype
        w_block = K * tc_pad * itemsize
        per_row = 2 * K * itemsize + 2 * tc_pad * 4
        avail = self._budget - 2 * w_block
        if avail < per_row * sub:
            return self._xla_forward(x)              # fail soft, never mis-compile
        TB = _pick_batch_tile(B, per_row, avail, sub, max_tile_rows)
        n_btile = pl.cdiv(B, TB)

        x_flat = x.reshape(B, C * L)
        out_pad = pl.pallas_call(
            functools.partial(_dct_kernel, precision=precision),
            out_shape=jax.ShapeDtypeStruct((B, n_ctile * tc_pad), jnp.float32),
            grid=(n_ctile, n_btile),                 # channel OUTER: W block is
            in_specs=[                               # DMA'd once per channel tile
                pl.BlockSpec((TB, K), lambda j, i: (i, j)),
                pl.BlockSpec((None, K, tc_pad), lambda j, i: (j, 0, 0)),
            ],
            out_specs=pl.BlockSpec((TB, tc_pad), lambda j, i: (i, j)),
            compiler_params=pltpu.CompilerParams(
                dimension_semantics=("parallel", "parallel"),
                vmem_limit_bytes=self._vmem_limit,
            ),
        )(x_flat, w_seg)

        out = out_pad.reshape(B, n_ctile, tc_pad)[:, :, :tc]
        return out.reshape(B, C)


# ---------------------------------------------------------------------------
# Reference (pure JAX) for verification
# ---------------------------------------------------------------------------
def dct_layer_ref(x, weight):
    return jnp.sum(x.astype(jnp.float32) * weight[None, :, :], axis=-1)


if __name__ == "__main__":
    # Module config mirroring the PyTorch layer: length=16, channel=4,
    # mapper_x whose length divides channel.
    length, channel, mapper_x, batch = 16, 4, [0, 2], 2
    layer = PallasDCTLayer(length, mapper_x, channel)

    key = jax.random.PRNGKey(0)
    x = jax.random.normal(key, (batch, channel, length), dtype=jnp.float32)
    out = jax.block_until_ready(layer(x, force_kernel=True))
    ref = dct_layer_ref(x, layer.weight)
    assert out.shape == (batch, channel)
    assert jnp.allclose(out, ref, atol=1e-5, rtol=1e-5), "mismatch (small f32)"

    # Multi-block pipelined batch grid (f32, HIGHEST precision, grid=(1,4)).
    layer64 = PallasDCTLayer(16, [0, 2, 4, 6], 64)
    x2 = jax.random.normal(jax.random.PRNGKey(0), (64, 64, 16), dtype=jnp.float32)
    out2 = jax.block_until_ready(layer64(x2, force_kernel=True, max_tile_rows=16))
    ref2 = dct_layer_ref(x2, layer64.weight)
    assert out2.shape == (64, 64)
    assert jnp.allclose(out2, ref2, atol=1e-5, rtol=1e-5), "mismatch (tiled f32)"

    # bf16 end-to-end + block-diagonal channel tiling (C=256 -> 2 channel tiles).
    layer256 = PallasDCTLayer(16, [0, 1, 2, 3], 256)
    x3 = jax.random.normal(jax.random.PRNGKey(0), (32, 256, 16), dtype=jnp.bfloat16)
    out3 = jax.block_until_ready(layer256(x3, force_kernel=True))
    ref3 = dct_layer_ref(x3.astype(jnp.float32), layer256.weight)
    assert out3.shape == (32, 256)
    assert jnp.allclose(out3, ref3, atol=2e-2, rtol=2e-2), "mismatch (bf16 tiled)"

    print("KERNEL_OK")
</pallas_src>

<mosaic_0001>
module attributes {stable_mosaic.version = 11 : i64} {
  func.func @_dct_kernel(%arg0: i32, %arg1: i32, %arg2: memref<2x64xf32, #tpu.memory_space<vmem>>, %arg3: memref<1x64x128xf32, #tpu.memory_space<vmem>>, %arg4: memref<2x128xf32, #tpu.memory_space<vmem>>) attributes {dimension_semantics = [#tpu.dimension_semantics<parallel>, #tpu.dimension_semantics<parallel>], iteration_bounds = array<i64: 1, 1>, scalar_prefetch = 0 : i64, scratch_operands = 0 : i64, tpu.core_type = #tpu.core_type<tc>, window_params = [{transform_indices = @transform_0, window_bounds = array<i64: 2, 64>}, {transform_indices = @transform_1, window_bounds = array<i64: 1, 64, 128>}, {transform_indices = @transform_2, window_bounds = array<i64: 2, 128>}]} {
    %c0 = arith.constant 0 : index
    %c0_0 = arith.constant 0 : index
    %0 = vector.load %arg2[%c0, %c0_0] : memref<2x64xf32, #tpu.memory_space<vmem>>, vector<2x64xf32>
    %c0_1 = arith.constant 0 : index
    %c0_2 = arith.constant 0 : index
    %c0_3 = arith.constant 0 : index
    %1 = vector.load %arg3[%c0_1, %c0_2, %c0_3] : memref<1x64x128xf32, #tpu.memory_space<vmem>>, vector<1x64x128xf32>
    %2 = vector.shape_cast %1 : vector<1x64x128xf32> to vector<64x128xf32>
    %cst = arith.constant dense<0.000000e+00> : vector<2x128xf32>
    %3 = tpu.matmul %0, %2, %cst {dimension_numbers = #tpu.dot_dimension_numbers<[1], [0], [0], [1], [0, 0, 1, 1], [], []>, precision = #tpu.contract_precision<fp32>} : vector<2x64xf32>, vector<64x128xf32>, vector<2x128xf32> -> vector<2x128xf32>
    %c0_4 = arith.constant 0 : index
    %c0_5 = arith.constant 0 : index
    %4 = vector.load %arg4[%c0_4, %c0_5] : memref<2x128xf32, #tpu.memory_space<vmem>>, vector<2x128xf32>
    tpu.vector_store %arg4[%c0_4, %c0_5], %3 {strides = array<i32>} : memref<2x128xf32, #tpu.memory_space<vmem>>, vector<2x128xf32>,
    return
  }
  func.func @transform_0(%arg0: i32, %arg1: i32) -> (i32, i32) {
    %c0_i32 = arith.constant 0 : i32
    return %arg1, %arg0 : i32, i32
  }
  func.func @transform_1(%arg0: i32, %arg1: i32) -> (i32, i32, i32) {
    %c0_i32 = arith.constant 0 : i32
    %c0_i32_0 = arith.constant 0 : i32
    %c0_i32_1 = arith.constant 0 : i32
    return %arg0, %c0_i32, %c0_i32_0 : i32, i32, i32
  }
  func.func @transform_2(%arg0: i32, %arg1: i32) -> (i32, i32) {
    %c0_i32 = arith.constant 0 : i32
    return %arg1, %arg0 : i32, i32
  }
}

</mosaic_0001>

<bundles_post_ra>
// kernel: tpu_custom_call.1
= control target key start
LH: loop header
LB: loop body
LE: loop exit
PB: predicated region body
PF: predicated region fallthrough
CT: control target
= control target key end

     0   :  { %7 = vsyncpa [#allocation3], 0  ;;  %s1073_s0 = inlined_call_operand.hbm [shape: f32[2,64], index: 0, kind: input, shape index: {}]   ;;  %s1074_s1 = inlined_call_operand.hbm [shape: f32[1,64,128], index: 1, kind: input, shape index: {}]   ;;  %s1075_s2 = inlined_call_operand.hbm [shape: f32[2,128], index: 2, kind: output, shape index: {}]  }
   0x1   :  { %8 = vsyncpa [#allocation6], 0 }
   0x2   :  { %9 = vsyncpa [#allocation4], 0  ;;  %s846_s9 = smov [#allocation2]   ;;  %s847_s11 = smov [#allocation5]  }
   0x3   :  { %s16_s10 = sshll.u32 %s846_s9, 4  ;;  %s25_s12 = sshll.u32 %s847_s11, 4  ;;  %s17_s10 = int_to_ptr.vmem [resolvable:$true] %s16_s10  ;;  %s26_s12 = int_to_ptr.vmem [resolvable:$true] %s25_s12 }
   0x4   :  { %s788_s13 = scalar_lea.vmem %s17_s10, 32  ;;  %p793_p1 = scmp.lt.s32.totalorder %s17_s10, %s17_s10 }
   0x5   :  { %p789_p0 = scmp.ne.s32.totalorder %s17_s10, %s788_s13  ;;  %p794_p2 = scmp.lt.s32.totalorder %s788_s13, %s788_s13 }
   0x7   :  { %p795_p3 = por %p794_p2, %p793_p1 }
   0x9   :  { %p796_p4 = pnand %p795_p3, %p789_p0 }
   0xb   :  { %799 = shalt.err (!%p796_p4)
}
   0xc   :  { %19 = dma.hbm_to_vmem [thread:$0]  %s1073_s0, 32, %s17_s10, [#allocation3]  }
   0xd   :  { %s808_s16 = scalar_lea.vmem %s26_s12, 1024  ;;  %p813_p6 = scmp.lt.s32.totalorder %s26_s12, %s26_s12 }
   0xe   :  { %p809_p5 = scmp.ne.s32.totalorder %s26_s12, %s808_s16  ;;  %p814_p7 = scmp.lt.s32.totalorder %s808_s16, %s808_s16 }
  0x10   :  { %p815_p8 = por %p814_p7, %p813_p6 }
  0x12   :  { %p816_p9 = pnand %p815_p8, %p809_p5 }
  0x14   :  { %819 = shalt.err (!%p816_p9)
}
  0x15   :  { %s848_s17 = smov 128   ;;  %s849_s18 = smov 8  }
  0x16   :  { %31 = dma.hbm_to_vmem [thread:$0]  %s1074_s1, 1024, %s26_s12, [#allocation6], %s848_s17, %s848_s17, %s849_s18  }
  0x17   :  { %840 = dma.done.wait [#allocation3], 32  }
  0x18   :  { %841 = vsyncadd [#allocation3], 4294967264 }
  0x19   :  { %842 = dma.done.wait [#allocation6], 1024  }
  0x1a   :  { %843 = vsyncadd [#allocation6], 4294966272  ;;  %v850_v0 = vmov 0.0   ;;  %vm851_vm0 = vmmov 0   ;;  %v46_v1 = vld [vmem:[#allocation5 + $0x38] sm:$0xff]  ;;  %v45_v2 = vld [vmem:[#allocation5 + $0x30] sm:$0xff] }
  0x1b   :  { %659 = vmatprep.subr.mxu0 %v850_v0  ;;  %678 = vmatprep.subr.mxu1 %v850_v0  ;;  %v44_v3 = vld [vmem:[#allocation5 + $0x28] sm:$0xff]  ;;  %vm47_vm1 = vcmask 523264   ;;  %v880_v4 = vand.u32 4294901760, %v46_v1  ;;  %v882_v5 = vand.u32 4294901760, %v45_v2  ;;  %v43_v7 = vld [vmem:[#allocation5 + $0x20] sm:$0xff]  ;;  %v42_v8 = vld [vmem:[#allocation5 + $0x18] sm:$0xff] }
  0x1c   :  { %675 = vmatprep.mubr.msk.f32.mxu0 %vm851_vm0, %v850_v0  ;;  %694 = vmatprep.mubr.msk.f32.mxu1 %vm851_vm0, %v850_v0  ;;  %v884_v6 = vand.u32 4294901760, %v44_v3  ;;  %v41_v9 = vld [vmem:[#allocation5 + $0x10] sm:$0xff]  ;;  %v886_v10 = vand.u32 4294901760, %v43_v7  ;;  %v888_v11 = vand.u32 4294901760, %v42_v8  ;;  %v40_v13 = vld [vmem:[#allocation5 + $0x8] sm:$0xff]  ;;  %v39_v14 = vld [vmem:[#allocation5] sm:$0xff] }
  0x1d   :  { %v890_v12 = vand.u32 4294901760, %v41_v9  ;;  %660 = vmatpush3.msra.mxu0 %v880_v4  ;;  %v894_v15 = vsub.f32 %v46_v1, %v880_v4  ;;  %v897_v16 = vsub.f32 %v45_v2, %v882_v5  ;;  %v899_v17 = vand.u32 4294901760, %v40_v13  ;;  %v38_v19 = vld [vmem:[#allocation2] sm:$0x3]  ;;  %s852_s0 = smov [#allocation7]  }
  0x1e   :  { %v902_v18 = vsub.f32 %v44_v3, %v884_v6  ;;  %661 = vmatprep.subr.mxu0 %v850_v0  ;;  %v905_v20 = vand.u32 4294901760, %v39_v14  ;;  %v908_v21 = vsub.f32 %v43_v7, %v886_v10  ;;  %v49_v22 = vsel %vm47_vm1, %v38_v19, 0  ;;  %s595_s1 = sshll.u32 %s852_s0, 4  ;;  %s596_s1 = int_to_ptr.vmem [resolvable:$true] %s595_s1 }
  0x1f   :  { %v912_v23 = vsub.f32 %v42_v8, %v888_v11  ;;  %662 = vmatpush3.msra.mxu0 %v882_v5  ;;  %v153_v24 = vand.u32 4294901760, %v894_v15  ;;  %v160_v25 = vand.u32 4294901760, %v897_v16  ;;  %v918_v27 = vand.u32 4294901760, %v49_v22  ;;  %s820_s21 = scalar_lea.vmem %s596_s1, 32  ;;  %p825_p11 = scmp.lt.s32.totalorder %s596_s1, %s596_s1 }
  0x20   :  { %v167_v26 = vand.u32 4294901760, %v902_v18  ;;  %663 = vmatprep.subr.mxu0 %v850_v0  ;;  %v174_v28 = vand.u32 4294901760, %v908_v21  ;;  %v924_v30 = vsub.f32 %v41_v9, %v890_v12  ;;  %v927_v31 = vsub.f32 %v40_v13, %v899_v17  ;;  %p821_p10 = scmp.ne.s32.totalorder %s596_s1, %s820_s21  ;;  %p826_p12 = scmp.lt.s32.totalorder %s820_s21, %s820_s21 }
  0x21   :  { %v181_v29 = vand.u32 4294901760, %v912_v23  ;;  %664 = vmatpush3.msra.mxu0 %v884_v6  ;;  %v154_v32 = vsub.f32 %v894_v15, %v153_v24  ;;  %v161_v33 = vsub.f32 %v897_v16, %v160_v25  ;;  %v940_v35 = vsub.f32 %v49_v22, %v918_v27 }
  0x22   :  { %v168_v34 = vsub.f32 %v902_v18, %v167_v26  ;;  %665 = vmatprep.subr.mxu0 %v850_v0  ;;  %v175_v36 = vsub.f32 %v908_v21, %v174_v28  ;;  %v188_v40 = vand.u32 4294901760, %v924_v30  ;;  %v195_v44 = vand.u32 4294901760, %v927_v31  ;;  %p827_p13 = por %p826_p12, %p825_p11 }
  0x23   :  { %666 = vmatpush3.msra.mxu0 %v886_v10  ;;  %v155_v37 = vand.u32 4294901760, %v154_v32  ;;  %v162_v38 = vand.u32 4294901760, %v161_v33  ;;  %v126_v39 = vand.u32 4294901760, %v940_v35  ;;  %v182_v41 = vsub.f32 %v912_v23, %v181_v29 }
  0x24   :  { %667 = vmatprep.subr.mxu0 %v850_v0  ;;  %v169_v42 = vand.u32 4294901760, %v168_v34  ;;  %v959_v45 = vsub.f32 %v39_v14, %v905_v20  ;;  %v176_v46 = vand.u32 4294901760, %v175_v36  ;;  %v189_v47 = vsub.f32 %v924_v30, %v188_v40  ;;  %p828_p0 = pnand %p827_p13, %p821_p10 }
  0x25   :  { %668 = vmatpush3.msra.mxu0 %v888_v11  ;;  %679 = vmatpush3.msra.mxu1 %v155_v37  ;;  %v127_v43 = vsub.f32 %v940_v35, %v126_v39  ;;  %v183_v50 = vand.u32 4294901760, %v182_v41  ;;  %v196_v51 = vsub.f32 %v927_v31, %v195_v44 }
  0x26   :  { %669 = vmatprep.subr.mxu0 %v850_v0  ;;  %680 = vmatprep.subr.mxu1 %v850_v0  ;;  %v202_v48 = vand.u32 4294901760, %v959_v45  ;;  %v190_v52 = vand.u32 4294901760, %v189_v47 }
  0x27   :  { %670 = vmatpush3.msra.mxu0 %v890_v12  ;;  %681 = vmatpush3.msra.mxu1 %v162_v38  ;;  %v128_v49 = vand.u32 4294901760, %v127_v43  ;;  %v197_v54 = vand.u32 4294901760, %v196_v51 }
  0x28   :  { %671 = vmatprep.subr.mxu0 %v850_v0  ;;  %682 = vmatprep.subr.mxu1 %v850_v0  ;;  %v203_v53 = vsub.f32 %v959_v45, %v202_v48 }
  0x29   :  { %672 = vmatpush3.msra.mxu0 %v899_v17  ;;  %683 = vmatpush3.msra.mxu1 %v169_v42 }
  0x2a   :  { %673 = vmatprep.subr.mxu0 %v850_v0  ;;  %684 = vmatprep.subr.mxu1 %v850_v0  ;;  %v204_v55 = vand.u32 4294901760, %v203_v53 }
  0x2b   :  { %674 = vmatpush3.msra.mxu0 %v905_v20  ;;  %685 = vmatpush3.msra.mxu1 %v176_v46 }
  0x2c   :  { %686 = vmatprep.subr.mxu1 %v850_v0  ;;  %697 = vmatprep.subr.mxu0 %v850_v0 }
  0x2d   :  { %676 = vmatmul.mubr.f32.vlgmr.msra.gmra.mxu0 %v128_v49  ;;  %687 = vmatpush3.msra.mxu1 %v183_v50 }
  0x2e   :  { %698 = vmatpush3.msra.mxu0 %v894_v15  ;;  %688 = vmatprep.subr.mxu1 %v850_v0 }
  0x2f   :  { %699 = vmatprep.subr.mxu0 %v850_v0  ;;  %689 = vmatpush3.msra.mxu1 %v190_v52 }
  0x30   :  { %700 = vmatpush3.msra.mxu0 %v897_v16  ;;  %690 = vmatprep.subr.mxu1 %v850_v0 }
  0x31   :  { %701 = vmatprep.subr.mxu0 %v850_v0  ;;  %691 = vmatpush3.msra.mxu1 %v197_v54 }
  0x32   :  { %702 = vmatpush3.msra.mxu0 %v902_v18  ;;  %692 = vmatprep.subr.mxu1 %v850_v0 }
  0x33   :  { %703 = vmatprep.subr.mxu0 %v850_v0  ;;  %693 = vmatpush3.msra.mxu1 %v204_v55 }
  0x34   :  { %704 = vmatpush3.msra.mxu0 %v908_v21  ;;  %695 = vmatmul.mubr.f32.vlgmr.msra.gmra.mxu1 %v918_v27 }
  0x35   :  { %705 = vmatprep.subr.mxu0 %v850_v0  ;;  %716 = vmatprep.subr.mxu1 %v850_v0 }
  0x36   :  { %706 = vmatpush3.msra.mxu0 %v912_v23  ;;  %717 = vmatpush3.msra.mxu1 %v880_v4 }
  0x37   :  { %707 = vmatprep.subr.mxu0 %v850_v0  ;;  %718 = vmatprep.subr.mxu1 %v850_v0 }
  0x38   :  { %708 = vmatpush3.msra.mxu0 %v924_v30  ;;  %719 = vmatpush3.msra.mxu1 %v882_v5 }
  0x39   :  { %709 = vmatprep.subr.mxu0 %v850_v0  ;;  %720 = vmatprep.subr.mxu1 %v850_v0 }
  0x3a   :  { %710 = vmatpush3.msra.mxu0 %v927_v31  ;;  %721 = vmatpush3.msra.mxu1 %v884_v6 }
  0x3b   :  { %711 = vmatprep.subr.mxu0 %v850_v0  ;;  %722 = vmatprep.subr.mxu1 %v850_v0 }
  0x3c   :  { %712 = vmatpush3.msra.mxu0 %v959_v45  ;;  %713 = vmatprep.mubr.msk.f32.mxu0 %vm851_vm0, %v850_v0 }
  0x3d   :  { %723 = vmatpush3.msra.mxu1 %v886_v10  ;;  %714 = vmatmul.mubr.f32.vlgmr.msra.gmra.mxu0 %v940_v35 }
  0x3e   :  { %724 = vmatprep.subr.mxu1 %v850_v0  ;;  %735 = vmatprep.subr.mxu0 %v850_v0 }
  0x3f   :  { %725 = vmatpush3.msra.mxu1 %v888_v11  ;;  %736 = vmatpush3.msra.mxu0 %v153_v24 }
  0x40   :  { %726 = vmatprep.subr.mxu1 %v850_v0  ;;  %737 = vmatprep.subr.mxu0 %v850_v0 }
  0x41   :  { %727 = vmatpush3.msra.mxu1 %v890_v12  ;;  %738 = vmatpush3.msra.mxu0 %v160_v25 }
  0x42   :  { %728 = vmatprep.subr.mxu1 %v850_v0  ;;  %739 = vmatprep.subr.mxu0 %v850_v0 }
  0x43   :  { %729 = vmatpush3.msra.mxu1 %v899_v17  ;;  %740 = vmatpush3.msra.mxu0 %v167_v26 }
  0x44   :  { %730 = vmatprep.subr.mxu1 %v850_v0  ;;  %741 = vmatprep.subr.mxu0 %v850_v0 }
  0x45   :  { %731 = vmatpush3.msra.mxu1 %v905_v20  ;;  %732 = vmatprep.mubr.msk.f32.mxu1 %vm851_vm0, %v850_v0 }
  0x46   :  { %742 = vmatpush3.msra.mxu0 %v174_v28  ;;  %733 = vmatmul.mubr.f32.vlgmr.msra.gmra.mxu1 %v126_v39 }
  0x47   :  { %743 = vmatprep.subr.mxu0 %v850_v0  ;;  %754 = vmatprep.subr.mxu1 %v850_v0 }
  0x48   :  { %744 = vmatpush3.msra.mxu0 %v181_v29  ;;  %755 = vmatpush3.msra.mxu1 %v880_v4 }
  0x49   :  { %745 = vmatprep.subr.mxu0 %v850_v0  ;;  %756 = vmatprep.subr.mxu1 %v850_v0 }
  0x4a   :  { %746 = vmatpush3.msra.mxu0 %v188_v40  ;;  %757 = vmatpush3.msra.mxu1 %v882_v5 }
  0x4b   :  { %747 = vmatprep.subr.mxu0 %v850_v0  ;;  %758 = vmatprep.subr.mxu1 %v850_v0 }
  0x4c   :  { %748 = vmatpush3.msra.mxu0 %v195_v44  ;;  %759 = vmatpush3.msra.mxu1 %v884_v6 }
  0x4d   :  { %749 = vmatprep.subr.mxu0 %v850_v0  ;;  %760 = vmatprep.subr.mxu1 %v850_v0 }
  0x4e   :  { %750 = vmatpush3.msra.mxu0 %v202_v48  ;;  %751 = vmatprep.mubr.msk.f32.mxu0 %vm851_vm0, %v850_v0 }
  0x4f   :  { %761 = vmatpush3.msra.mxu1 %v886_v10  ;;  %752 = vmatmul.mubr.f32.vlgmr.msra.gmra.mxu0 %v918_v27 }
  0x50   :  { %762 = vmatprep.subr.mxu1 %v850_v0  ;;  %770 = vmatprep.mubr.msk.f32.mxu1 %vm851_vm0, %v850_v0 }
  0x51   :  { %763 = vmatpush3.msra.mxu1 %v888_v11 }
  0x52   :  { %764 = vmatprep.subr.mxu1 %v850_v0 }
  0x53   :  { %765 = vmatpush3.msra.mxu1 %v890_v12 }
  0x54   :  { %766 = vmatprep.subr.mxu1 %v850_v0 }
  0x55   :  { %767 = vmatpush3.msra.mxu1 %v899_v17 }
  0x56   :  { %768 = vmatprep.subr.mxu1 %v850_v0 }
  0x57   :  { %769 = vmatpush3.msra.mxu1 %v905_v20 }
  0x58   :  { %771 = vmatmul.mubr.f32.vlgmr.msra.gmra.mxu1 %v918_v27 }
  0xed   :  { %v130_v56 = vpop.f32.mrf.mxu0 }
  0xef   :  { %v677_v57 = vpop.f32.mrf.mxu0 }
  0xf4   :  { %v241_v58 = vpop.f32.mrf.mxu1 }
  0xf5   :  { %v242_v2 = vadd.f32 %v241_v58, %v130_v56 }
  0xf6   :  { %v696_v59 = vpop.f32.mrf.mxu1 }
  0xfd   :  { %v329_v60 = vpop.f32.mrf.mxu0 }
  0xfe   :  { %v330_v4 = vadd.f32 %v329_v60, %v242_v2 }
  0xff   :  { %v715_v61 = vpop.f32.mrf.mxu0 }
 0x106   :  { %v410_v62 = vpop.f32.mrf.mxu1 }
 0x107   :  { %v411_v5 = vadd.f32 %v410_v62, %v330_v4 }
 0x108   :  { %v734_v63 = vpop.f32.mrf.mxu1 }
 0x10f   :  { %v505_v1 = vpop.f32.mrf.mxu0 }
 0x110   :  { %v506_v0 = vadd.f32 %v505_v1, %v411_v5 }
 0x111   :  { %v753_v3 = vpop.f32.mrf.mxu0 }
 0x118   :  { %v584_v6 = vpop.f32.mrf.mxu1 }
 0x119   :  { %v585_v7 = vadd.f32 %v584_v6, %v506_v0 }
 0x11a   :  { %v772_v8 = vpop.f32.mrf.mxu1 }
 0x11b   :  { %588 = vst [vmem:[#allocation7] sm:$0x3] %v585_v7 }
 0x11c   :  { %831 = shalt.err (!%p828_p0)
}
 0x11d   :  { %598 = dma.vmem_to_hbm [thread:$0]  %s596_s1, 32, %s1075_s2, [#allocation4]  }
 0x11e   :  { %844 = dma.done.wait [#allocation4], 32  }
 0x11f   :  { %845 = vsyncadd [#allocation4], 4294967264 }
 0x120   :  { %602 = vsyncpa [#allocation3], 1 }
 0x121   :  { %603 = vsyncpa [#allocation6], 1 }
 0x122   :  { %604 = vsyncpa [#allocation4], 1 }

</bundles_post_ra>
